<compile_context>
chip_gen: v6e
topology: v6e:2x2x1
jax: 0.10.0
libtpu: 0.0.40
codegen_flags: <defaults>
</compile_context>

<pallas_src>
import functools

import jax
import jax.numpy as jnp
from jax import lax
from jax.experimental import pallas as pl
from jax.experimental.pallas import tpu as pltpu


def _round_up(n, m):
    return ((n + m - 1) // m) * m


def _min_row_tile(dtype):
    # Sublane minimum: 32-bit -> 8 rows, 16-bit -> 16, 8-bit -> 32.
    itemsize = jnp.dtype(dtype).itemsize
    return 8 * max(1, 4 // itemsize)


@functools.lru_cache(maxsize=1)
def _vmem_budgets():
    """Return (vmem_limit_bytes, per-call tile data budget), generation-aware.

    128-MiB-VMEM parts (v5e/v6e): 96 MiB limit, 48 MiB tile data budget.
    64-MiB-VMEM parts (v7x):      48 MiB limit, 24 MiB tile data budget.
    """
    cap = None
    try:
        cap = getattr(pltpu.get_tpu_info(), "vmem_capacity_bytes", None)
    except Exception:
        cap = None
    if not cap:
        cap = 64 * 1024 * 1024          # conservative fallback: v7x-sized VMEM
    limit = min((cap * 3) // 4, cap - 8 * 1024 * 1024)
    limit = max(limit, 8 * 1024 * 1024)
    return int(limit), int(limit // 2)


def _choose_row_tile(rows, per_row_bytes, min_rows, data_budget,
                     reserved_bytes=0, max_row_tile=2048):
    budget = max(data_budget - reserved_bytes, per_row_bytes * min_rows)
    tile = budget // max(per_row_bytes, 1)
    tile = min(tile, max_row_tile)
    tile = max(min_rows, (tile // min_rows) * min_rows)
    # Never allocate a block taller than the (sublane-rounded) input.
    tile = min(tile, _round_up(rows, min_rows))
    # On large inputs keep >= 2 grid steps so v7x's two TensorCores both get
    # work (adds at most one ~0.35us step on single-TC v5e/v6e).
    if rows >= 1024:
        tile = min(tile, max(min_rows, _round_up(pl.cdiv(rows, 2), min_rows)))
    return max(tile, min_rows)


# ----------------------------------------------------------------------------
# Standalone LayerNorm kernel (rows on sublanes, normalized dim D on lanes).
# ----------------------------------------------------------------------------
def _layernorm_kernel(x_ref, g_ref, b_ref, o_ref, *, eps: float, inv_d: float):
    x = x_ref[...].astype(jnp.float32)
    mean = jnp.sum(x, axis=-1, keepdims=True) * inv_d
    centered = x - mean
    var = jnp.sum(centered * centered, axis=-1, keepdims=True) * inv_d
    y = centered * lax.rsqrt(var + eps) * g_ref[...] + b_ref[...]
    o_ref[...] = y.astype(o_ref.dtype)


def pallas_layernorm(x, gamma, beta, *, eps: float = 1e-5):
    """LayerNorm over the last dim of x (any leading dims), via Pallas."""
    orig_shape = x.shape
    d = orig_shape[-1]
    x2 = x.reshape(-1, d)
    rows = x2.shape[0]

    vmem_limit, data_budget = _vmem_budgets()
    in_b = jnp.dtype(x.dtype).itemsize
    per_row = (2 * d * in_b      # double-buffered input tile rows
               + 2 * d * in_b    # double-buffered output tile rows
               + 2 * d * 4)      # in-kernel f32 intermediates (x_f32, centered)
    tile = _choose_row_tile(rows, per_row, _min_row_tile(x.dtype), data_budget,
                            reserved_bytes=4 * d * 4,   # gamma/beta (f32)
                            max_row_tile=2048)

    g2 = gamma.reshape(1, d).astype(jnp.float32)
    b2 = beta.reshape(1, d).astype(jnp.float32)

    out = pl.pallas_call(
        functools.partial(_layernorm_kernel, eps=eps, inv_d=1.0 / d),
        out_shape=jax.ShapeDtypeStruct((rows, d), x.dtype),
        grid=(pl.cdiv(rows, tile),),
        in_specs=[
            pl.BlockSpec((tile, d), lambda i: (i, 0)),
            pl.BlockSpec((1, d), lambda i: (0, 0)),
            pl.BlockSpec((1, d), lambda i: (0, 0)),
        ],
        out_specs=pl.BlockSpec((tile, d), lambda i: (i, 0)),
        compiler_params=pltpu.CompilerParams(
            dimension_semantics=("parallel",),
            vmem_limit_bytes=vmem_limit,
        ),
    )(x2, g2, b2)
    return out.reshape(orig_shape)


# ----------------------------------------------------------------------------
# Fused LayerNorm + Linear kernel (PreNorm -> dense-projection fusion).
# Avoids writing the normalized activations to HBM and re-reading them.
# ----------------------------------------------------------------------------
def _layernorm_matmul_kernel(x_ref, g_ref, b_ref, w_ref, o_ref, *,
                             eps: float, inv_d: float, mxu_dtype):
    x = x_ref[...].astype(jnp.float32)
    mean = jnp.sum(x, axis=-1, keepdims=True) * inv_d
    centered = x - mean
    var = jnp.sum(centered * centered, axis=-1, keepdims=True) * inv_d
    y = centered * lax.rsqrt(var + eps) * g_ref[...] + b_ref[...]
    # bf16 MXU inputs (portable fast path on v5e/v6e/v7x), f32 accumulation.
    o_ref[...] = jnp.dot(
        y.astype(mxu_dtype), w_ref[...], preferred_element_type=jnp.float32
    ).astype(o_ref.dtype)


def pallas_layernorm_linear(x, gamma, beta, w, *, eps: float = 1e-5,
                            mxu_dtype=jnp.bfloat16):
    """Fused LayerNorm(x) @ w.

    The weight is converted to `mxu_dtype` (bf16 by default) and, when too big
    to keep resident, streamed as (d, tile_n) column tiles down a second grid
    axis; the LayerNorm is recomputed per n-tile (VPU cost hides under the
    MXU/DMA) while the x row-tile stays resident across that axis.
    """
    # TODO(synk): K-tiling of the contraction dim for extremely large d.
    orig_shape = x.shape
    d = orig_shape[-1]
    e = w.shape[-1]
    x2 = x.reshape(-1, d)
    rows = x2.shape[0]

    vmem_limit, data_budget = _vmem_budgets()
    w = w.astype(mxu_dtype)
    w_b = jnp.dtype(mxu_dtype).itemsize
    in_b = jnp.dtype(x.dtype).itemsize
    out_b = jnp.dtype(x.dtype).itemsize

    # Output-dim tile: keep w fully resident when it fits in ~half the data
    # budget, otherwise stream column tiles (multiples of 128; 512 preferred
    # on the 2x256^2 MXUs of v6e/v7x).
    if e <= 512 or 2 * d * e * w_b <= data_budget // 2:
        tile_n = e
    else:
        tile_n = 512
        while tile_n > 128 and 2 * d * tile_n * w_b > data_budget // 2:
            tile_n //= 2

    per_row = (2 * d * in_b          # double-buffered x tiles
               + 2 * tile_n * out_b  # double-buffered output tiles
               + 2 * d * 4           # f32 LayerNorm intermediates
               + d * w_b             # y cast to MXU dtype
               + tile_n * 4)         # f32 matmul accumulator
    reserved = 2 * d * tile_n * w_b + 4 * d * 4   # w tiles + gamma/beta (f32)
    tile_m = _choose_row_tile(rows, per_row, _min_row_tile(x.dtype),
                              data_budget, reserved_bytes=reserved,
                              max_row_tile=1024)

    g2 = gamma.reshape(1, d).astype(jnp.float32)
    b2 = beta.reshape(1, d).astype(jnp.float32)

    out = pl.pallas_call(
        functools.partial(_layernorm_matmul_kernel, eps=eps, inv_d=1.0 / d,
                          mxu_dtype=mxu_dtype),
        out_shape=jax.ShapeDtypeStruct((rows, e), x.dtype),
        grid=(pl.cdiv(rows, tile_m), pl.cdiv(e, tile_n)),
        in_specs=[
            pl.BlockSpec((tile_m, d), lambda i, j: (i, 0)),  # resident across j
            pl.BlockSpec((1, d), lambda i, j: (0, 0)),
            pl.BlockSpec((1, d), lambda i, j: (0, 0)),
            pl.BlockSpec((d, tile_n), lambda i, j: (0, j)),
        ],
        out_specs=pl.BlockSpec((tile_m, tile_n), lambda i, j: (i, j)),
        compiler_params=pltpu.CompilerParams(
            dimension_semantics=("parallel", "parallel"),
            vmem_limit_bytes=vmem_limit,
        ),
    )(x2, g2, b2, w)
    return out.reshape(orig_shape[:-1] + (e,))


# ----------------------------------------------------------------------------
# PreNorm module equivalent.
# ----------------------------------------------------------------------------
class PreNormPallas:
    """JAX/Pallas equivalent of the PyTorch PreNorm module.

    norm / norm_context are LayerNorms computed in Pallas TPU kernels; `fn` is
    an arbitrary callable applied afterwards (same as the PyTorch module).
    When `fn` begins with a dense projection, use `normed_projection` to fuse
    LayerNorm with that projection and skip one HBM round trip of the
    normalized activations.
    """
    # TODO(synk): when x and context share D, batch both LayerNorms into one
    # pallas_call to amortize launch overhead.

    def __init__(self, dim, fn, context_dim=None):
        self.fn = fn
        self.dim = dim
        self.context_dim = context_dim
        # Deterministic synthetic LayerNorm parameters (PyTorch default init is
        # ones/zeros; perturb slightly so scale/shift is actually exercised).
        self.norm_gamma = 1.0 + 0.01 * jnp.arange(dim, dtype=jnp.float32)
        self.norm_beta = 0.001 * jnp.arange(dim, dtype=jnp.float32)
        if context_dim is not None:
            self.ctx_gamma = 1.0 + 0.02 * jnp.arange(context_dim, dtype=jnp.float32)
            self.ctx_beta = -0.002 * jnp.arange(context_dim, dtype=jnp.float32)
        else:
            self.ctx_gamma = None
            self.ctx_beta = None

    def __call__(self, x, **kwargs):
        x = pallas_layernorm(x, self.norm_gamma, self.norm_beta)
        if self.ctx_gamma is not None:
            context = kwargs["context"]
            normed_context = pallas_layernorm(context, self.ctx_gamma, self.ctx_beta)
            kwargs.update(context=normed_context)
        return self.fn(x, **kwargs)

    def normed_projection(self, x, w, *, eps: float = 1e-5):
        """Fused LayerNorm(x) @ w for when `fn` starts with a dense projection."""
        return pallas_layernorm_linear(x, self.norm_gamma, self.norm_beta, w, eps=eps)


if __name__ == "__main__":
    # Small, lane-dense shapes (D multiple of 128 -> full-width vst stores).
    B, S, DIM = 2, 8, 128
    S_CTX, CTX_DIM = 8, 128

    key = jax.random.PRNGKey(0)
    kx, kc, kw1, kw2 = jax.random.split(key, 4)
    x = jax.random.normal(kx, (B, S, DIM), dtype=jnp.float32)
    context = jax.random.normal(kc, (B, S_CTX, CTX_DIM), dtype=jnp.float32)

    # `fn` in the original module is an arbitrary sub-module (e.g. attention);
    # here a deterministic linear mix of the normed x and normed context.
    w_x = jax.random.normal(kw1, (DIM, DIM), dtype=jnp.float32) * 0.1
    w_c = jax.random.normal(kw2, (CTX_DIM, DIM), dtype=jnp.float32) * 0.1

    def fn(x, context=None):
        out = jnp.einsum("bsd,de->bse", x, w_x)
        if context is not None:
            ctx_proj = jnp.einsum("bkc,cd->bkd", context, w_c)
            out = out + ctx_proj.mean(axis=1, keepdims=True)
        return out

    prenorm = PreNormPallas(DIM, fn, context_dim=CTX_DIM)
    out = prenorm(x, context=context)
    jax.block_until_ready(out)

    # Pure-JAX LayerNorm reference.
    def ln_ref(v, g, b, eps=1e-5):
        m = v.mean(-1, keepdims=True)
        var = ((v - m) ** 2).mean(-1, keepdims=True)
        return (v - m) / jnp.sqrt(var + eps) * g + b

    ref = fn(
        ln_ref(x, prenorm.norm_gamma, prenorm.norm_beta),
        context=ln_ref(context, prenorm.ctx_gamma, prenorm.ctx_beta),
    )
    assert jnp.allclose(out, ref, atol=1e-4, rtol=1e-4)

    # Fused LN + first projection of fn (bf16 MXU inputs, f32 accumulation);
    # reference uses bf16-rounded inputs so the comparison isolates the fusion.
    fused = prenorm.normed_projection(x, w_x)
    jax.block_until_ready(fused)
    y_ref = ln_ref(x, prenorm.norm_gamma, prenorm.norm_beta)
    fused_ref = jnp.einsum(
        "bsd,de->bse",
        y_ref.astype(jnp.bfloat16).astype(jnp.float32),
        w_x.astype(jnp.bfloat16).astype(jnp.float32),
        precision=lax.Precision.HIGHEST,
    )
    assert jnp.allclose(fused, fused_ref, atol=2e-2, rtol=2e-2)

    # Non-tile-divisible rows: exercises the cdiv grid's partial last block
    # (no jnp.pad, no trailing slice; Pallas masks the partial block writes).
    x_odd = jax.random.normal(kx, (3, 5, DIM), dtype=jnp.float32)
    out_odd = pallas_layernorm(x_odd, prenorm.norm_gamma, prenorm.norm_beta)
    jax.block_until_ready(out_odd)
    assert jnp.allclose(
        out_odd, ln_ref(x_odd, prenorm.norm_gamma, prenorm.norm_beta),
        atol=1e-4, rtol=1e-4,
    )

    print("KERNEL_OK")
</pallas_src>

<mosaic_0001>
module attributes {stable_mosaic.version = 11 : i64} {
  func.func @_layernorm_kernel(%arg0: i32, %arg1: memref<16x128xf32, #tpu.memory_space<vmem>>, %arg2: memref<1x128xf32, #tpu.memory_space<vmem>>, %arg3: memref<1x128xf32, #tpu.memory_space<vmem>>, %arg4: memref<16x128xf32, #tpu.memory_space<vmem>>) attributes {dimension_semantics = [#tpu.dimension_semantics<parallel>], iteration_bounds = array<i64: 1>, scalar_prefetch = 0 : i64, scratch_operands = 0 : i64, tpu.core_type = #tpu.core_type<tc>, window_params = [{transform_indices = @transform_0, window_bounds = array<i64: 16, 128>}, {pipeline_mode = #tpu.pipeline_mode<synchronous>, transform_indices = @transform_1, window_bounds = array<i64: 1, 128>}, {pipeline_mode = #tpu.pipeline_mode<synchronous>, transform_indices = @transform_2, window_bounds = array<i64: 1, 128>}, {transform_indices = @transform_3, window_bounds = array<i64: 16, 128>}]} {
    %c0 = arith.constant 0 : index
    %c0_0 = arith.constant 0 : index
    %0 = vector.load %arg1[%c0, %c0_0] : memref<16x128xf32, #tpu.memory_space<vmem>>, vector<16x128xf32>
    %cst = arith.constant dense<0.000000e+00> : vector<16xf32>
    %1 = vector.multi_reduction <add>, %0, %cst [1] : vector<16x128xf32> to vector<16xf32>
    %2 = vector.shape_cast %1 : vector<16xf32> to vector<16x1xf32>
    %cst_1 = arith.constant 7.812500e-03 : f32
    %3 = vector.broadcast %cst_1 : f32 to vector<16x1xf32>
    %4 = arith.mulf %2, %3 : vector<16x1xf32>
    %5 = vector.broadcast %4 : vector<16x1xf32> to vector<16x128xf32>
    %6 = arith.subf %0, %5 : vector<16x128xf32>
    %7 = arith.mulf %6, %6 : vector<16x128xf32>
    %cst_2 = arith.constant dense<0.000000e+00> : vector<16xf32>
    %8 = vector.multi_reduction <add>, %7, %cst_2 [1] : vector<16x128xf32> to vector<16xf32>
    %9 = vector.shape_cast %8 : vector<16xf32> to vector<16x1xf32>
    %cst_3 = arith.constant 7.812500e-03 : f32
    %10 = vector.broadcast %cst_3 : f32 to vector<16x1xf32>
    %11 = arith.mulf %9, %10 : vector<16x1xf32>
    %cst_4 = arith.constant 9.99999974E-6 : f32
    %12 = vector.broadcast %cst_4 : f32 to vector<16x1xf32>
    %13 = arith.addf %11, %12 : vector<16x1xf32>
    %14 = math.rsqrt %13 : vector<16x1xf32>
    %15 = vector.broadcast %14 : vector<16x1xf32> to vector<16x128xf32>
    %16 = arith.mulf %6, %15 : vector<16x128xf32>
    %c0_5 = arith.constant 0 : index
    %c0_6 = arith.constant 0 : index
    %17 = vector.load %arg2[%c0_5, %c0_6] : memref<1x128xf32, #tpu.memory_space<vmem>>, vector<1x128xf32>
    %18 = vector.broadcast %17 : vector<1x128xf32> to vector<16x128xf32>
    %19 = arith.mulf %16, %18 : vector<16x128xf32>
    %c0_7 = arith.constant 0 : index
    %c0_8 = arith.constant 0 : index
    %20 = vector.load %arg3[%c0_7, %c0_8] : memref<1x128xf32, #tpu.memory_space<vmem>>, vector<1x128xf32>
    %21 = vector.broadcast %20 : vector<1x128xf32> to vector<16x128xf32>
    %22 = arith.addf %19, %21 : vector<16x128xf32>
    %c0_9 = arith.constant 0 : index
    %c0_10 = arith.constant 0 : index
    %23 = vector.load %arg4[%c0_9, %c0_10] : memref<16x128xf32, #tpu.memory_space<vmem>>, vector<16x128xf32>
    tpu.vector_store %arg4[%c0_9, %c0_10], %22 {strides = array<i32>} : memref<16x128xf32, #tpu.memory_space<vmem>>, vector<16x128xf32>,
    return
  }
  func.func @transform_0(%arg0: i32) -> (i32, i32) {
    %c0_i32 = arith.constant 0 : i32
    %c0_i32_0 = arith.constant 0 : i32
    return %arg0, %c0_i32 : i32, i32
  }
  func.func @transform_1(%arg0: i32) -> (i32, i32) {
    %c0_i32 = arith.constant 0 : i32
    %c0_i32_0 = arith.constant 0 : i32
    %c0_i32_1 = arith.constant 0 : i32
    return %c0_i32, %c0_i32_0 : i32, i32
  }
  func.func @transform_2(%arg0: i32) -> (i32, i32) {
    %c0_i32 = arith.constant 0 : i32
    %c0_i32_0 = arith.constant 0 : i32
    %c0_i32_1 = arith.constant 0 : i32
    return %c0_i32, %c0_i32_0 : i32, i32
  }
  func.func @transform_3(%arg0: i32) -> (i32, i32) {
    %c0_i32 = arith.constant 0 : i32
    %c0_i32_0 = arith.constant 0 : i32
    return %arg0, %c0_i32 : i32, i32
  }
}

</mosaic_0001>

<bundles_post_ra>
// kernel: tpu_custom_call.1
= control target key start
LH: loop header
LB: loop body
LE: loop exit
PB: predicated region body
PF: predicated region fallthrough
CT: control target
= control target key end

     0   :  { %8 = vsyncpa [#allocation3], 0  ;;  %s186_s0 = inlined_call_operand.hbm [shape: f32[16,128], index: 0, kind: input, shape index: {}]   ;;  %s187_s1 = inlined_call_operand.vmem [shape: f32[1,128], index: 1, kind: input, shape index: {}]   ;;  %s188_s2 = inlined_call_operand.vmem [shape: f32[1,128], index: 2, kind: input, shape index: {}]   ;;  %s189_s3 = inlined_call_operand.hbm [shape: f32[16,128], index: 3, kind: output, shape index: {}]  }
   0x1   :  { %9 = vsyncpa [#allocation4], 0  ;;  %s144_s12 = smov [#allocation2]  }
   0x2   :  { %s15_s13 = sshll.u32 %s144_s12, 4  ;;  %s16_s13 = int_to_ptr.vmem [resolvable:$true] %s15_s13 }
   0x3   :  { %s108_s14 = scalar_lea.vmem %s16_s13, 256  ;;  %p113_p1 = scmp.lt.s32.totalorder %s16_s13, %s16_s13 }
   0x4   :  { %p109_p0 = scmp.ne.s32.totalorder %s16_s13, %s108_s14  ;;  %p114_p2 = scmp.lt.s32.totalorder %s108_s14, %s108_s14 }
   0x6   :  { %p115_p3 = por %p114_p2, %p113_p1 }
   0x8   :  { %p116_p4 = pnand %p115_p3, %p109_p0 }
   0xa   :  { %119 = shalt.err (!%p116_p4)
}
   0xb   :  { %s145_s15 = smov 128   ;;  %s146_s16 = smov 8  }
   0xc   :  { %21 = dma.hbm_to_vmem [thread:$0]  %s186_s0, 256, %s16_s13, [#allocation3], %s145_s15, %s145_s15, %s146_s16  }
   0xd   :  { %140 = dma.done.wait [#allocation3], 256  }
   0xe   :  { %141 = vsyncadd [#allocation3], 4294967040  ;;  %v29_v0 = vld [vmem:[#allocation2] sm:$0xff]  ;;  %v30_v1 = vld [vmem:[#allocation2 + $0x8] sm:$0xff]  ;;  %s147_s22 = smov [#allocation5]  }
   0xf   :  { %31 = vadd.xlane.f32.xlu0 %v29_v0  ;;  %v90_v17 = vld [vmem:[%s187_s1] ss:$0 sm:$0xff]  ;;  %s78_s23 = sshll.u32 %s147_s22, 4  ;;  %s79_s23 = int_to_ptr.vmem [resolvable:$true] %s78_s23 }
  0x10   :  { %v91_v19 = vld [vmem:[%s188_s2] ss:$0 sm:$0xff]  ;;  %s120_s24 = scalar_lea.vmem %s79_s23, 256  ;;  %p125_p6 = scmp.lt.s32.totalorder %s79_s23, %s79_s23 }
  0x11   :  { %p121_p5 = scmp.ne.s32.totalorder %s79_s23, %s120_s24  ;;  %p126_p7 = scmp.lt.s32.totalorder %s120_s24, %s120_s24 }
  0x13   :  { %33 = vadd.xlane.f32.xlu0 %v30_v1  ;;  %p127_p8 = por %p126_p7, %p125_p6 }
  0x15   :  { %p128_p9 = pnand %p127_p8, %p121_p5 }
  0x98   :  { %v32_v2 = vpop.xlane.xlu0 %31 }
  0x99   :  { %v35_v3 = vmul.f32 0.0078125, %v32_v2 }
  0x9b   :  { %v37_v4 = vsub.f32 %v29_v0, %v35_v3 }
  0x9c   :  { %v34_v5 = vpop.xlane.xlu0 %33 }
  0x9d   :  { %v36_v6 = vmul.f32 0.0078125, %v34_v5  ;;  %v39_v7 = vmul.f32 %v37_v4, %v37_v4 }
  0x9f   :  { %v38_v8 = vsub.f32 %v30_v1, %v36_v6  ;;  %41 = vadd.xlane.f32.xlu1 %v39_v7 }
  0xa1   :  { %v40_v9 = vmul.f32 %v38_v8, %v38_v8 }
  0xa3   :  { %43 = vadd.xlane.f32.xlu1 %v40_v9 }
 0x128   :  { %v42_v10 = vpop.xlane.xlu1 %41 }
 0x129   :  { %v45_v11 = vmul.f32 0.0078125, %v42_v10 }
 0x12b   :  { %v47_v12 = vadd.f32 1e-05, %v45_v11 }
 0x12c   :  { %v44_v13 = vpop.xlane.xlu1 %43 }
 0x12d   :  { %96 = vrsqrt.f32 %v47_v12  ;;  %v46_v14 = vmul.f32 0.0078125, %v44_v13 }
 0x12f   :  { %v48_v15 = vadd.f32 1e-05, %v46_v14 }
 0x131   :  { %98 = vrsqrt.f32 %v48_v15 }
 0x13a   :  { %v97_v16 = vpop.eup %96 }
 0x13b   :  { %v51_v18 = vmul.f32 %v97_v16, %v37_v4 }
 0x13d   :  { %v60_v20 = vmul.f32 %v90_v17, %v51_v18 }
 0x13e   :  { %v99_v21 = vpop.eup %98 }
 0x13f   :  { %v52_v22 = vmul.f32 %v99_v21, %v38_v8  ;;  %v69_v23 = vadd.f32 %v91_v19, %v60_v20 }
 0x141   :  { %v61_v24 = vmul.f32 %v90_v17, %v52_v22  ;;  %71 = vst [vmem:[#allocation5] sm:$0xff] %v69_v23 }
 0x143   :  { %v70_v25 = vadd.f32 %v91_v19, %v61_v24 }
 0x145   :  { %72 = vst [vmem:[#allocation5 + $0x8] sm:$0xff] %v70_v25 }
 0x146   :  { %131 = shalt.err (!%p128_p9)
}
 0x147   :  { %84 = dma.vmem_to_hbm [thread:$0]  %s79_s23, 256, %s189_s3, [#allocation4], %s145_s15, %s145_s15, %s146_s16  }
 0x148   :  { %142 = dma.done.wait [#allocation4], 256  }
 0x149   :  { %143 = vsyncadd [#allocation4], 4294967040 }
 0x14a   :  { %88 = vsyncpa [#allocation3], 1 }
 0x14b   :  { %89 = vsyncpa [#allocation4], 1 }

</bundles_post_ra>
